<compile_context>
chip_gen: v5e
topology: v5e:2x2
jax: 0.10.0
libtpu: 0.0.40
codegen_flags: <defaults>
</compile_context>

<pallas_src>
import jax
import jax.numpy as jnp
from jax.scipy.special import erf as _ref_erf
from jax.experimental import pallas as pl
from jax.experimental.pallas import tpu as pltpu


_SQRT_HALF = 0.7071067811865476


# ----------------------------------------------------------------------------
# In-kernel exact GELU (erf-based, matches PyTorch nn.GELU() default).
# erf via Abramowitz & Stegun 7.1.26 (max abs err ~1.5e-7); only exp / mul /
# add / select / reciprocal — all guaranteed to lower on Mosaic.
# ----------------------------------------------------------------------------
def _erf_f32(x):
    a1 = 0.254829592
    a2 = -0.284496736
    a3 = 1.421413741
    a4 = -1.453152027
    a5 = 1.061405429
    p = 0.3275911
    z = jnp.abs(x)
    # reciprocal on the EUP slot instead of a VALU divide.
    t = pl.reciprocal(1.0 + p * z, approx=True)
    poly = ((((a5 * t + a4) * t + a3) * t + a2) * t + a1) * t
    y = 1.0 - poly * jnp.exp(-z * z)
    return jnp.where(x < 0.0, -y, y)


def _gelu_exact_f32(x):
    return 0.5 * x * (1.0 + _erf_f32(x * _SQRT_HALF))


# ----------------------------------------------------------------------------
# Fused FFN kernel. Grid = (M tiles, H tiles); H is the reduction axis (last,
# "arbitrary"). Per step:
#   h_tile = gelu(x_tile @ W1[:, h] + b1[h])          (f32)
#   acc   += h_tile.bf16 @ W2[h, :]                   (f32 accumulate)
# Finalize (h == last): out = acc + b2. The (tm, H) hidden activation never
# exists — only a (tm, th) slice lives in vregs, and acc is (tm, D) in VMEM.
# ----------------------------------------------------------------------------
def _ffn_kernel(x_ref, w1_ref, b1_ref, w2_ref, b2_ref, o_ref, acc_ref):
    h_idx = pl.program_id(1)

    @pl.when(h_idx == 0)
    def _init():
        acc_ref[...] = jnp.zeros_like(acc_ref)

    h = jnp.dot(x_ref[...], w1_ref[...], preferred_element_type=jnp.float32)
    h = _gelu_exact_f32(h + b1_ref[...])
    acc_ref[...] += jnp.dot(h.astype(jnp.bfloat16), w2_ref[...],
                            preferred_element_type=jnp.float32)

    @pl.when(h_idx == pl.num_programs(1) - 1)
    def _finalize():
        # Dropout (p = 0.0) is the identity.  b2 added exactly once here.
        o_ref[...] = (acc_ref[...] + b2_ref[...]).astype(o_ref.dtype)


# ----------------------------------------------------------------------------
# Host-side wrappers
# ----------------------------------------------------------------------------
def _round_up(x, m):
    return ((x + m - 1) // m) * m


def _default_vmem_limit_bytes():
    # ~75% of per-core VMEM (headroom for double-buffers / compiler scratch),
    # capped at 112 MiB.  v7x(64 MiB) -> ~48 MiB, v5e/v6e(128 MiB) -> ~96 MiB.
    try:
        cap = int(pltpu.get_tpu_info().vmem_capacity_bytes)
        return min(cap * 3 // 4, 112 * 1024 * 1024)
    except Exception:
        return 48 * 1024 * 1024


def prepare_ffn_params(params, *, th=512, compute_dtype=jnp.bfloat16):
    """One-time weight prep: transpose, cast to bf16, zero-pad H to th tiles.

    Do this once at load time so the forward path never re-materializes
    transposed/cast weight copies in HBM.
    """
    w1 = jnp.asarray(params["w1"])   # (H, D)  PyTorch layout
    b1 = jnp.asarray(params["b1"])   # (H,)
    w2 = jnp.asarray(params["w2"])   # (D, H)
    b2 = jnp.asarray(params["b2"])   # (D,)
    H, D = w1.shape
    assert w2.shape == (D, H) and b1.shape == (H,) and b2.shape == (D,)

    if th >= H:
        th_eff, Hp = H, H                       # single H tile (full dim)
    else:
        th_eff = max(128, (th // 128) * 128)    # lane-aligned streamed tile
        Hp = _round_up(H, th_eff)

    w1t = jnp.transpose(w1).astype(compute_dtype)    # (D, H)
    w2t = jnp.transpose(w2).astype(compute_dtype)    # (H, D)
    b1r = b1.reshape(1, H).astype(jnp.float32)
    b2r = b2.reshape(1, D).astype(jnp.float32)
    if Hp != H:
        # Zero padding is exact: gelu(0 + 0) == 0 and padded W2 rows are 0.
        w1t = jnp.pad(w1t, ((0, 0), (0, Hp - H)))
        w2t = jnp.pad(w2t, ((0, Hp - H), (0, 0)))
        b1r = jnp.pad(b1r, ((0, 0), (0, Hp - H)))

    return dict(w1t=w1t, b1=b1r, w2t=w2t, b2=b2r,
                D=D, Hp=Hp, th=th_eff, compute_dtype=compute_dtype)


def feed_forward(x, prep, *, tm=256, vmem_limit_bytes=None):
    """FeedForward.forward: x (..., D) -> (..., D) using prepared params."""
    D, Hp, th = prep["D"], prep["Hp"], prep["th"]
    orig_shape = x.shape
    assert orig_shape[-1] == D
    xm = x.reshape(-1, D).astype(prep["compute_dtype"])
    M = xm.shape[0]

    # Row tile: multiple of 16 (bf16 sublane pack), capped at the row count.
    # Tune per generation: ~256 (v7x), ~512 (v6e), 128-multiples (v5e); keep
    # >=2 M tiles on v7x so both TensorCores get work.
    tm_eff = min(tm, _round_up(M, 16))
    tm_eff = max(16, (tm_eff // 16) * 16)

    grid = (pl.cdiv(M, tm_eff), Hp // th)

    if vmem_limit_bytes is None:
        vmem_limit_bytes = _default_vmem_limit_bytes()

    out = pl.pallas_call(
        _ffn_kernel,
        out_shape=jax.ShapeDtypeStruct((M, D), x.dtype),
        grid=grid,
        in_specs=[
            pl.BlockSpec((tm_eff, D), lambda i, h: (i, 0)),   # x rows
            pl.BlockSpec((D, th), lambda i, h: (0, h)),       # W1^T streamed
            pl.BlockSpec((1, th), lambda i, h: (0, h)),       # b1 streamed
            pl.BlockSpec((th, D), lambda i, h: (h, 0)),       # W2^T streamed
            pl.BlockSpec((1, D), lambda i, h: (0, 0)),        # b2 (tiny)
        ],
        out_specs=pl.BlockSpec((tm_eff, D), lambda i, h: (i, 0)),
        scratch_shapes=[pltpu.VMEM((tm_eff, D), jnp.float32)],   # f32 accumulator
        compiler_params=pltpu.CompilerParams(
            dimension_semantics=("parallel", "arbitrary"),
            vmem_limit_bytes=int(vmem_limit_bytes),
        ),
    )(xm, prep["w1t"], prep["b1"], prep["w2t"], prep["b2"])

    return out.reshape(orig_shape)


# ----------------------------------------------------------------------------
# Example / self-check
# ----------------------------------------------------------------------------
if __name__ == "__main__":
    def _torch_linear_init(kw, kb, out_f, in_f):
        # PyTorch nn.Linear default init: U(-1/sqrt(fan_in), 1/sqrt(fan_in)).
        bound = 1.0 / (in_f ** 0.5)
        w = jax.random.uniform(kw, (out_f, in_f), jnp.float32, -bound, bound)
        b = jax.random.uniform(kb, (out_f,), jnp.float32, -bound, bound)
        return w, b

    def _ref_ffn(x, params):
        h = x @ params["w1"].T + params["b1"]
        h = 0.5 * h * (1.0 + _ref_erf(h / jnp.sqrt(2.0)))
        return h @ params["w2"].T + params["b2"]     # dropout p=0.0 -> identity

    def _check(batch, seq, dim, hidden, tm, th, key):
        k_x, k_w1, k_b1, k_w2, k_b2 = jax.random.split(key, 5)
        w1, b1 = _torch_linear_init(k_w1, k_b1, hidden, dim)
        w2, b2 = _torch_linear_init(k_w2, k_b2, dim, hidden)
        params = {"w1": w1, "b1": b1, "w2": w2, "b2": b2}
        x = jax.random.normal(k_x, (batch, seq, dim), jnp.float32)

        prep = prepare_ffn_params(params, th=th)
        out = jax.block_until_ready(feed_forward(x, prep, tm=tm))
        ref = _ref_ffn(x, params)

        assert out.shape == ref.shape == (batch, seq, dim)
        assert bool(jnp.all(jnp.isfinite(out)))
        rel = float(jnp.max(jnp.abs(out - ref)) /
                    (jnp.max(jnp.abs(ref)) + 1e-6))
        # bf16 MXU operands -> loose tolerance vs. the f32 reference.
        assert rel < 5e-2, f"relative error too large: {rel}"

    key = jax.random.PRNGKey(0)
    k0, k1 = jax.random.split(key)

    # Small shapes implied by the module (single grid step).
    _check(batch=2, seq=8, dim=32, hidden=64, tm=256, th=512, key=k0)
    # Slightly larger: exercises M tiling (ragged tail), H streaming and the
    # accumulator init / finalize branches (grid = (3, 2)).
    _check(batch=2, seq=66, dim=128, hidden=512, tm=64, th=256, key=k1)

    print("KERNEL_OK")
</pallas_src>

<mosaic_0001>
module attributes {stable_mosaic.version = 11 : i64} {
  func.func @_ffn_kernel(%arg0: i32, %arg1: i32, %arg2: memref<16x32xbf16, #tpu.memory_space<vmem>>, %arg3: memref<32x64xbf16, #tpu.memory_space<vmem>>, %arg4: memref<1x64xf32, #tpu.memory_space<vmem>>, %arg5: memref<64x32xbf16, #tpu.memory_space<vmem>>, %arg6: memref<1x32xf32, #tpu.memory_space<vmem>>, %arg7: memref<16x32xf32, #tpu.memory_space<vmem>>, %arg8: memref<16x32xf32, #tpu.memory_space<vmem>>) attributes {dimension_semantics = [#tpu.dimension_semantics<parallel>, #tpu.dimension_semantics<arbitrary>], iteration_bounds = array<i64: 1, 1>, scalar_prefetch = 0 : i64, scratch_operands = 1 : i64, tpu.core_type = #tpu.core_type<tc>, window_params = [{transform_indices = @transform_0, window_bounds = array<i64: 16, 32>}, {transform_indices = @transform_1, window_bounds = array<i64: 32, 64>}, {transform_indices = @transform_2, window_bounds = array<i64: 1, 64>}, {transform_indices = @transform_3, window_bounds = array<i64: 64, 32>}, {pipeline_mode = #tpu.pipeline_mode<synchronous>, transform_indices = @transform_4, window_bounds = array<i64: 1, 32>}, {transform_indices = @transform_5, window_bounds = array<i64: 16, 32>}]} {
    %c0_i32 = arith.constant 0 : i32
    %0 = arith.cmpi eq, %arg1, %c0_i32 : i32
    %1 = arith.extui %0 : i1 to i32
    %c0_i32_0 = arith.constant 0 : i32
    %2 = arith.cmpi ne, %1, %c0_i32_0 : i32
    scf.if %2 {
      %cst_29 = arith.constant 0.000000e+00 : f32
      %57 = vector.broadcast %cst_29 : f32 to vector<16x32xf32>
      %c0_30 = arith.constant 0 : index
      %c0_31 = arith.constant 0 : index
      %58 = vector.load %arg8[%c0_30, %c0_31] : memref<16x32xf32, #tpu.memory_space<vmem>>, vector<16x32xf32>
      tpu.vector_store %arg8[%c0_30, %c0_31], %57 {strides = array<i32>} : memref<16x32xf32, #tpu.memory_space<vmem>>, vector<16x32xf32>,
    } else {
    }
    %c0 = arith.constant 0 : index
    %c0_1 = arith.constant 0 : index
    %3 = vector.load %arg2[%c0, %c0_1] : memref<16x32xbf16, #tpu.memory_space<vmem>>, vector<16x32xbf16>
    %c0_2 = arith.constant 0 : index
    %c0_3 = arith.constant 0 : index
    %4 = vector.load %arg3[%c0_2, %c0_3] : memref<32x64xbf16, #tpu.memory_space<vmem>>, vector<32x64xbf16>
    %cst = arith.constant dense<0.000000e+00> : vector<16x64xf32>
    %5 = tpu.matmul %3, %4, %cst {dimension_numbers = #tpu.dot_dimension_numbers<[1], [0], [0], [1], [0, 0, 1, 1], [], []>} : vector<16x32xbf16>, vector<32x64xbf16>, vector<16x64xf32> -> vector<16x64xf32>
    %c0_4 = arith.constant 0 : index
    %c0_5 = arith.constant 0 : index
    %6 = vector.load %arg4[%c0_4, %c0_5] : memref<1x64xf32, #tpu.memory_space<vmem>>, vector<1x64xf32>
    %7 = vector.broadcast %6 : vector<1x64xf32> to vector<16x64xf32>
    %8 = arith.addf %5, %7 : vector<16x64xf32>
    %cst_6 = arith.constant 5.000000e-01 : f32
    %9 = vector.broadcast %cst_6 : f32 to vector<16x64xf32>
    %10 = arith.mulf %9, %8 : vector<16x64xf32>
    %cst_7 = arith.constant 0.707106769 : f32
    %11 = vector.broadcast %cst_7 : f32 to vector<16x64xf32>
    %12 = arith.mulf %8, %11 : vector<16x64xf32>
    %13 = math.absf %12 : vector<16x64xf32>
    %cst_8 = arith.constant 0.327591091 : f32
    %14 = vector.broadcast %cst_8 : f32 to vector<16x64xf32>
    %15 = arith.mulf %14, %13 : vector<16x64xf32>
    %cst_9 = arith.constant 1.000000e+00 : f32
    %16 = vector.broadcast %cst_9 : f32 to vector<16x64xf32>
    %17 = arith.addf %16, %15 : vector<16x64xf32>
    %18 = tpu.reciprocal %17 {approx = true} : vector<16x64xf32> -> vector<16x64xf32>
    %cst_10 = arith.constant 1.06140542 : f32
    %19 = vector.broadcast %cst_10 : f32 to vector<16x64xf32>
    %20 = arith.mulf %19, %18 : vector<16x64xf32>
    %cst_11 = arith.constant -1.45315206 : f32
    %21 = vector.broadcast %cst_11 : f32 to vector<16x64xf32>
    %22 = arith.addf %20, %21 : vector<16x64xf32>
    %23 = arith.mulf %22, %18 : vector<16x64xf32>
    %cst_12 = arith.constant 1.42141378 : f32
    %24 = vector.broadcast %cst_12 : f32 to vector<16x64xf32>
    %25 = arith.addf %23, %24 : vector<16x64xf32>
    %26 = arith.mulf %25, %18 : vector<16x64xf32>
    %cst_13 = arith.constant -0.284496725 : f32
    %27 = vector.broadcast %cst_13 : f32 to vector<16x64xf32>
    %28 = arith.addf %26, %27 : vector<16x64xf32>
    %29 = arith.mulf %28, %18 : vector<16x64xf32>
    %cst_14 = arith.constant 0.254829586 : f32
    %30 = vector.broadcast %cst_14 : f32 to vector<16x64xf32>
    %31 = arith.addf %29, %30 : vector<16x64xf32>
    %32 = arith.mulf %31, %18 : vector<16x64xf32>
    %cst_15 = arith.constant 0.000000e+00 : f32
    %33 = vector.broadcast %cst_15 : f32 to vector<16x64xf32>
    %34 = arith.subf %33, %13 : vector<16x64xf32>
    %35 = arith.mulf %34, %13 : vector<16x64xf32>
    %36 = math.exp %35 : vector<16x64xf32>
    %37 = arith.mulf %32, %36 : vector<16x64xf32>
    %cst_16 = arith.constant 1.000000e+00 : f32
    %38 = vector.broadcast %cst_16 : f32 to vector<16x64xf32>
    %39 = arith.subf %38, %37 : vector<16x64xf32>
    %cst_17 = arith.constant 0.000000e+00 : f32
    %40 = vector.broadcast %cst_17 : f32 to vector<16x64xf32>
    %41 = arith.cmpf olt, %12, %40 : vector<16x64xf32>
    %cst_18 = arith.constant 0.000000e+00 : f32
    %42 = vector.broadcast %cst_18 : f32 to vector<16x64xf32>
    %43 = arith.subf %42, %39 : vector<16x64xf32>
    %44 = arith.select %41, %43, %39 : vector<16x64xi1>, vector<16x64xf32>
    %cst_19 = arith.constant 1.000000e+00 : f32
    %45 = vector.broadcast %cst_19 : f32 to vector<16x64xf32>
    %46 = arith.addf %45, %44 : vector<16x64xf32>
    %47 = arith.mulf %10, %46 : vector<16x64xf32>
    %c0_20 = arith.constant 0 : index
    %c0_21 = arith.constant 0 : index
    %48 = vector.load %arg8[%c0_20, %c0_21] : memref<16x32xf32, #tpu.memory_space<vmem>>, vector<16x32xf32>
    %49 = arith.truncf %47 : vector<16x64xf32> to vector<16x64xbf16>
    %c0_22 = arith.constant 0 : index
    %c0_23 = arith.constant 0 : index
    %50 = vector.load %arg5[%c0_22, %c0_23] : memref<64x32xbf16, #tpu.memory_space<vmem>>, vector<64x32xbf16>
    %cst_24 = arith.constant dense<0.000000e+00> : vector<16x32xf32>
    %51 = tpu.matmul %49, %50, %cst_24 {dimension_numbers = #tpu.dot_dimension_numbers<[1], [0], [0], [1], [0, 0, 1, 1], [], []>} : vector<16x64xbf16>, vector<64x32xbf16>, vector<16x32xf32> -> vector<16x32xf32>
    %52 = arith.addf %48, %51 : vector<16x32xf32>
    %c0_25 = arith.constant 0 : index
    %c0_26 = arith.constant 0 : index
    %53 = vector.load %arg8[%c0_25, %c0_26] : memref<16x32xf32, #tpu.memory_space<vmem>>, vector<16x32xf32>
    tpu.vector_store %arg8[%c0_25, %c0_26], %52 {strides = array<i32>} : memref<16x32xf32, #tpu.memory_space<vmem>>, vector<16x32xf32>,
    %c0_i32_27 = arith.constant 0 : i32
    %54 = arith.cmpi eq, %arg1, %c0_i32_27 : i32
    %55 = arith.extui %54 : i1 to i32
    %c0_i32_28 = arith.constant 0 : i32
    %56 = arith.cmpi ne, %55, %c0_i32_28 : i32
    scf.if %56 {
      %c0_29 = arith.constant 0 : index
      %c0_30 = arith.constant 0 : index
      %57 = vector.load %arg8[%c0_29, %c0_30] : memref<16x32xf32, #tpu.memory_space<vmem>>, vector<16x32xf32>
      %c0_31 = arith.constant 0 : index
      %c0_32 = arith.constant 0 : index
      %58 = vector.load %arg6[%c0_31, %c0_32] : memref<1x32xf32, #tpu.memory_space<vmem>>, vector<1x32xf32>
      %59 = vector.broadcast %58 : vector<1x32xf32> to vector<16x32xf32>
      %60 = arith.addf %57, %59 : vector<16x32xf32>
      %c0_33 = arith.constant 0 : index
      %c0_34 = arith.constant 0 : index
      %61 = vector.load %arg7[%c0_33, %c0_34] : memref<16x32xf32, #tpu.memory_space<vmem>>, vector<16x32xf32>
      tpu.vector_store %arg7[%c0_33, %c0_34], %60 {strides = array<i32>} : memref<16x32xf32, #tpu.memory_space<vmem>>, vector<16x32xf32>,
    } else {
    }
    return
  }
  func.func @transform_0(%arg0: i32, %arg1: i32) -> (i32, i32) {
    %c0_i32 = arith.constant 0 : i32
    %c0_i32_0 = arith.constant 0 : i32
    return %arg0, %c0_i32 : i32, i32
  }
  func.func @transform_1(%arg0: i32, %arg1: i32) -> (i32, i32) {
    %c0_i32 = arith.constant 0 : i32
    %c0_i32_0 = arith.constant 0 : i32
    return %c0_i32, %arg1 : i32, i32
  }
  func.func @transform_2(%arg0: i32, %arg1: i32) -> (i32, i32) {
    %c0_i32 = arith.constant 0 : i32
    %c0_i32_0 = arith.constant 0 : i32
    return %c0_i32, %arg1 : i32, i32
  }
  func.func @transform_3(%arg0: i32, %arg1: i32) -> (i32, i32) {
    %c0_i32 = arith.constant 0 : i32
    %c0_i32_0 = arith.constant 0 : i32
    return %arg1, %c0_i32 : i32, i32
  }
  func.func @transform_4(%arg0: i32, %arg1: i32) -> (i32, i32) {
    %c0_i32 = arith.constant 0 : i32
    %c0_i32_0 = arith.constant 0 : i32
    %c0_i32_1 = arith.constant 0 : i32
    return %c0_i32, %c0_i32_0 : i32, i32
  }
  func.func @transform_5(%arg0: i32, %arg1: i32) -> (i32, i32) {
    %c0_i32 = arith.constant 0 : i32
    %c0_i32_0 = arith.constant 0 : i32
    return %arg0, %c0_i32 : i32, i32
  }
}

</mosaic_0001>

<bundles_post_ra>
// kernel: tpu_custom_call.1
= control target key start
LH: loop header
LB: loop body
LE: loop exit
PB: predicated region body
PF: predicated region fallthrough
CT: control target
= control target key end

     0   :  { %s366_s0 = inlined_call_operand.vmem [shape: bf16[16,32], index: 0, kind: input, shape index: {}]   ;;  %s367_s1 = inlined_call_operand.vmem [shape: bf16[32,64], index: 1, kind: input, shape index: {}]   ;;  %s368_s2 = inlined_call_operand.vmem [shape: f32[1,64], index: 2, kind: input, shape index: {}]   ;;  %s369_s3 = inlined_call_operand.vmem [shape: bf16[64,32], index: 3, kind: input, shape index: {}]   ;;  %s370_s4 = inlined_call_operand.vmem [shape: f32[1,32], index: 4, kind: input, shape index: {}]   ;;  %s371_s5 = inlined_call_operand.hbm [shape: f32[16,32], index: 5, kind: output, shape index: {}]  }
   0x1   :  { %v246_v0 = vld [vmem:[%s367_s1 + $0x8] sm:$0xff] }
   0x2   :  { %10 = vsyncpa [#allocation4], 0  ;;  %66 = vmatpush.bf16.msra.mxu0 %v246_v0  ;;  %v245_v1 = vld [vmem:[%s367_s1] sm:$0xff]  ;;  %vm26_vm0 = vcmask 261120   ;;  %v250_v10 = vld [vmem:[%s369_s3 + $0x18] sm:$0xff]  ;;  %v291_v32 = vmov 0.0  }
   0x3   :  { %v244_v2 = vld [vmem:[%s366_s0] sm:$0xff]  ;;  %169 = vmatpush.bf16.msra.mxu1 %v250_v10  ;;  %v249_v14 = vld [vmem:[%s369_s3 + $0x10] sm:$0xff]  ;;  %v248_v17 = vld [vmem:[%s369_s3 + $0x8] sm:$0xff]  ;;  %27 = vst.msk [vmem:[#allocation2] sm:$0xff] %vm26_vm0, %v291_v32  ;;  %vm161_vm3 = vcmask 523264   ;;  %s292_s7 = smov [#allocation3]  }
   0x4   :  { %v255_v3 = vld [vmem:[%s368_s2] ss:$0 sm:$0xff]  ;;  %28 = vst.msk [vmem:[#allocation2 + $0x8] sm:$0xff] %vm26_vm0, %v291_v32  ;;  %s200_s8 = sshll.u32 %s292_s7, 4  ;;  %s202_s11 = sshll.u32 %s371_s5, 4  ;;  %s201_s8 = int_to_ptr.vmem [resolvable:$true] %s200_s8  ;;  %s203_s11 = int_to_ptr.hbm [resolvable:$true] %s202_s11 }
   0x5   :  { %v247_v23 = vld [vmem:[%s369_s3] sm:$0xff]  ;;  %s294_s12 = smov 8  }
   0x6   :  { %67 = vmatpush.bf16.msra.mxu0 %v245_v1 }
   0x7   :  { %170 = vmatpush.bf16.msra.mxu1 %v249_v14 }
   0x9   :  { %226 = vmatmul.msk.bf16.vlgmr.msra.gmra.mxu0 %vm26_vm0, %v244_v2 }
   0xa   :  { %v126_v0 = vld [vmem:[#allocation2] sm:$0xff] }
   0xb   :  { %171 = vmatpush.bf16.msra.mxu1 %v248_v17 }
   0xf   :  { %172 = vmatpush.bf16.msra.mxu1 %v247_v23 }
  0x86   :  { %v69_v4 = vpop.f32.mrf.mxu0 }
  0x87   :  { %v338_v5 = vadd.f32 %v255_v3, %v69_v4  ;;  %v256_v4 = vld [vmem:[%s370_s4] ss:$0 sm:$0xff]  ;;  %s293_s4 = smov 128  }
  0x89   :  { %v76_v6 = vmul.f32 0.70710677, %v338_v5  ;;  %v74_v58 = vmul.f32 0.5, %v338_v5 }
  0x8b   :  { %v78_v7 = vand.u32 2147483647, %v76_v6  ;;  %vm116_vm1 = vcmp.lt.f32.partialorder %v76_v6, 0.0 }
  0x8d   :  { %v80_v8 = vmul.f32 0.3275911, %v78_v7  ;;  %v104_v19 = vsub.f32 0.0, %v78_v7 }
  0x8e   :  { %v71_v9 = vpop.f32.mrf.mxu0 }
  0x8f   :  { %v82_v11 = vadd.f32 1.0, %v80_v8  ;;  %v72_v12 = vadd.f32 %v255_v3, %v71_v9  ;;  %v106_v24 = vmul.f32 %v104_v19, %v78_v7  ;;  %v127_v3 = vld [vmem:[#allocation2 + $0x8] sm:$0xff] }
  0x91   :  { %257 = vrcp.f32 %v82_v11  ;;  %v77_v13 = vmul.f32 0.70710677, %v72_v12  ;;  %v108_v28 = vmul.f32 1.442695, %v106_v24  ;;  %v75_v59 = vmul.f32 0.5, %v72_v12 }
  0x93   :  { %v79_v15 = vand.u32 2147483647, %v77_v13  ;;  %vm117_vm2 = vcmp.lt.f32.partialorder %v77_v13, 0.0 }
  0x95   :  { %v81_v16 = vmul.f32 0.3275911, %v79_v15  ;;  %v105_v29 = vsub.f32 0.0, %v79_v15 }
  0x97   :  { %v258_v18 = vpop.eup %257  ;;  %v83_v20 = vadd.f32 1.0, %v81_v16  ;;  %v107_v35 = vmul.f32 %v105_v29, %v79_v15 }
  0x98   :  { %v86_v21 = vmul.f32 1.0614054, %v258_v18 }
  0x99   :  { %259 = vrcp.f32 %v83_v20  ;;  %v110_v40 = vmul.f32 1.442695, %v107_v35 }
  0x9a   :  { %v88_v22 = vadd.f32 -1.4531521, %v86_v21  ;;  %261 = vpow2.f32 %v108_v28 }
  0x9b   :  { %263 = vpow2.f32 %v110_v40 }
  0x9c   :  { %v90_v25 = vmul.f32 %v258_v18, %v88_v22 }
  0x9e   :  { %v92_v26 = vadd.f32 1.4214138, %v90_v25 }
  0x9f   :  { %v260_v27 = vpop.eup %259 }
  0xa0   :  { %v94_v30 = vmul.f32 %v258_v18, %v92_v26  ;;  %v87_v31 = vmul.f32 1.0614054, %v260_v27  ;;  %v262_v43 = vpop.eup %261 }
  0xa1   :  { %v264_v51 = vpop.eup %263 }
  0xa2   :  { %v96_v33 = vadd.f32 -0.28449672, %v94_v30  ;;  %v89_v34 = vadd.f32 -1.4531521, %v87_v31 }
  0xa4   :  { %v98_v36 = vmul.f32 %v258_v18, %v96_v33  ;;  %v91_v37 = vmul.f32 %v260_v27, %v89_v34 }
  0xa6   :  { %v100_v38 = vadd.f32 0.2548296, %v98_v36  ;;  %v93_v39 = vadd.f32 1.4214138, %v91_v37 }
  0xa8   :  { %v102_v41 = vmul.f32 %v258_v18, %v100_v38  ;;  %v95_v42 = vmul.f32 %v260_v27, %v93_v39 }
  0xaa   :  { %v112_v44 = vmul.f32 %v262_v43, %v102_v41  ;;  %v97_v45 = vadd.f32 -0.28449672, %v95_v42 }
  0xac   :  { %v114_v46 = vsub.f32 1.0, %v112_v44  ;;  %v99_v47 = vmul.f32 %v260_v27, %v97_v45 }
  0xae   :  { %v101_v48 = vadd.f32 0.2548296, %v99_v47  ;;  %v118_v49 = vsub.f32 0.0, %v114_v46 }
  0xb0   :  { %v103_v50 = vmul.f32 %v260_v27, %v101_v48  ;;  %v120_v53 = vsel %vm116_vm1, %v118_v49, %v114_v46 }
  0xb1   :  { %v122_v56 = vadd.f32 1.0, %v120_v53 }
  0xb2   :  { %v113_v52 = vmul.f32 %v264_v51, %v103_v50 }
  0xb3   :  { %v124_v61 = vmul.f32 %v122_v56, %v74_v58 }
  0xb4   :  { %v115_v54 = vsub.f32 1.0, %v113_v52 }
  0xb6   :  { %v119_v55 = vsub.f32 0.0, %v115_v54 }
  0xb8   :  { %v121_v57 = vsel %vm117_vm2, %v119_v55, %v115_v54 }
  0xb9   :  { %v123_v60 = vadd.f32 1.0, %v121_v57 }
  0xbb   :  { %v125_v62 = vmul.f32 %v123_v60, %v75_v59 }
  0xbd   :  { %v128_v63 = vpack.c.bf16 %v125_v62, %v124_v61 }
  0xbf   :  { %243 = vmatmul.msk.bf16.vlgmr.msra.gmra.mxu1 %vm161_vm3, %v128_v63 }
 0x13c   :  { %v174_v1 = vpop.f32.mrf.mxu1 }
 0x13d   :  { %v179_v2 = vadd.f32 %v174_v1, %v126_v0 }
 0x13f   :  { %181 = vst.msk [vmem:[#allocation2] sm:$0xff] %vm26_vm0, %v179_v2 }
 0x144   :  { %v176_v6 = vpop.f32.mrf.mxu1 }
 0x145   :  { %v180_v7 = vadd.f32 %v176_v6, %v127_v3 }
 0x146   :  { %v186_v5 = vld [vmem:[#allocation2] sm:$0xff] }
 0x147   :  { %182 = vst.msk [vmem:[#allocation2 + $0x8] sm:$0xff] %vm26_vm0, %v180_v7  ;;  %v192_v8 = vadd.f32 %v256_v4, %v186_v5 }
 0x149   :  { %194 = vst.msk [vmem:[#allocation3] sm:$0xff] %vm26_vm0, %v192_v8 }
 0x14e   :  { %v187_v9 = vld [vmem:[#allocation2 + $0x8] sm:$0xff] }
 0x14f   :  { %v193_v10 = vadd.f32 %v256_v4, %v187_v9 }
 0x151   :  { %195 = vst.msk [vmem:[#allocation3 + $0x8] sm:$0xff] %vm26_vm0, %v193_v10 }
 0x152   :  { %208 = dma.vmem_to_hbm [thread:$0]  %s201_s8, 256, %s203_s11, [#allocation4], %s293_s4, %s293_s4, %s294_s12  }
 0x153   :  { %289 = dma.done.wait [#allocation4], 256  }
 0x154   :  { %290 = vsyncadd [#allocation4], 4294967040 }
 0x155   :  { %213 = vsyncpa [#allocation4], 1 }

</bundles_post_ra>
